<compile_context>
chip_gen: v7x
topology: tpu7x:2x2x1
jax: 0.10.0
libtpu: 0.0.40
codegen_flags: <defaults>
</compile_context>

<pallas_src>
import functools

import jax
import jax.numpy as jnp
from jax.experimental import pallas as pl
from jax.experimental.pallas import tpu as pltpu


# ---------------------------------------------------------------------------
# Parameter packing
# ---------------------------------------------------------------------------
def _round_up8(n):
    return ((n + 7) // 8) * 8


def _row_layout(input_dim, hidden_dim, output_dim):
    """Row offsets for [W1, b1, W2, b2, W3, b3] in one packed buffer.

    Each block starts on a sublane-aligned (multiple of 8) row. Columns are the
    layer output dims, padded to width = max(hidden_dim, output_dim)."""
    sizes = (input_dim, 1, hidden_dim, 1, hidden_dim, 1)
    offsets, total = [], 0
    for s in sizes:
        offsets.append(total)
        total += _round_up8(s)
    width = max(hidden_dim, output_dim)
    return tuple(offsets), total, width


def pack_params(raw_params, input_dim, hidden_dim, output_dim,
                dtype=jnp.float32):
    """raw_params = (w1, b1, w2, b2, w3, b3); weights already (in, out)."""
    offs, total_rows, width = _row_layout(input_dim, hidden_dim, output_dim)
    buf = jnp.zeros((total_rows, width), dtype)
    for off, p in zip(offs, raw_params):
        p2 = p if p.ndim == 2 else p.reshape(1, -1)
        buf = buf.at[off:off + p2.shape[0], :p2.shape[1]].set(p2.astype(dtype))
    return buf


# ---------------------------------------------------------------------------
# Kernel
# ---------------------------------------------------------------------------
def _policy_kernel(x_ref, p_ref, mu_ref, *, dims, offs):
    d_in, h, d_out = dims
    o_w1, o_b1, o_w2, o_b2, o_w3, o_b3 = offs

    params = p_ref[...]                      # one resident tile, a few KB
    cdt = params.dtype                       # compute dtype follows packing (f32 or bf16)

    w1 = params[o_w1:o_w1 + d_in, :h]
    b1 = params[o_b1:o_b1 + 1, :h].astype(jnp.float32)
    w2 = params[o_w2:o_w2 + h, :h]
    b2 = params[o_b2:o_b2 + 1, :h].astype(jnp.float32)
    w3 = params[o_w3:o_w3 + h, :d_out]
    b3 = params[o_b3:o_b3 + 1, :d_out].astype(jnp.float32)

    x = x_ref[...].astype(cdt)
    a = jnp.dot(x, w1, preferred_element_type=jnp.float32) + b1      # MXU, f32 acc
    a = jnp.maximum(a, 0.0).astype(cdt)                              # VPU
    a = jnp.dot(a, w2, preferred_element_type=jnp.float32) + b2
    a = jnp.maximum(a, 0.0).astype(cdt)
    mu = jnp.dot(a, w3, preferred_element_type=jnp.float32) + b3
    mu_ref[...] = jnp.tanh(mu).astype(mu_ref.dtype)                  # EUP tanh


# ---------------------------------------------------------------------------
# Wrapper
# ---------------------------------------------------------------------------
@functools.partial(jax.jit,
                   static_argnames=("input_dim", "hidden_dim", "output_dim"))
def deterministic_policy_forward(x, packed_params, *, input_dim, hidden_dim,
                                 output_dim):
    B, d_in = x.shape
    assert d_in == input_dim
    offs, _, _ = _row_layout(input_dim, hidden_dim, output_dim)

    # Give v7x's second TensorCore work when the batch splits cleanly;
    # otherwise one full-batch tile (single-TC chips only pay per-step overhead).
    if B >= 16 and B % 16 == 0:
        tb = B // 2
    else:
        tb = B

    kernel = functools.partial(
        _policy_kernel,
        dims=(input_dim, hidden_dim, output_dim),
        offs=offs,
    )

    bytes_per_elem = jnp.dtype(packed_params.dtype).itemsize
    cost = pl.CostEstimate(
        flops=2 * B * (input_dim * hidden_dim
                       + hidden_dim * hidden_dim
                       + hidden_dim * output_dim),
        transcendentals=B * output_dim,
        bytes_accessed=(x.size * 4
                        + packed_params.size * bytes_per_elem
                        + B * output_dim * 4),
    )

    mu = pl.pallas_call(
        kernel,
        out_shape=jax.ShapeDtypeStruct((B, output_dim), jnp.float32),
        grid_spec=pltpu.PrefetchScalarGridSpec(
            num_scalar_prefetch=0,
            grid=(pl.cdiv(B, tb),),
            in_specs=[
                pl.BlockSpec((tb, input_dim), lambda i: (i, 0)),
                # single full-extent DMA for all packed parameters
                pl.BlockSpec(packed_params.shape, lambda i: (0, 0)),
            ],
            out_specs=pl.BlockSpec((tb, output_dim), lambda i: (i, 0)),
        ),
        compiler_params=pltpu.CompilerParams(
            dimension_semantics=("parallel",)),
        cost_estimate=cost,
    )(x, packed_params)
    return mu


# ---------------------------------------------------------------------------
# Init (PyTorch nn.Linear default: U(-1/sqrt(fan_in), 1/sqrt(fan_in)))
# ---------------------------------------------------------------------------
def init_linear(key, fan_in, fan_out):
    kw, kb = jax.random.split(key)
    bound = 1.0 / jnp.sqrt(jnp.float32(fan_in))
    w = jax.random.uniform(kw, (fan_in, fan_out), jnp.float32, -bound, bound)
    b = jax.random.uniform(kb, (1, fan_out), jnp.float32, -bound, bound)
    return w, b


def init_params(key, input_dim, hidden_dim, output_dim):
    k1, k2, k3 = jax.random.split(key, 3)
    params = []
    for k, (fi, fo) in zip((k1, k2, k3), ((input_dim, hidden_dim),
                                          (hidden_dim, hidden_dim),
                                          (hidden_dim, output_dim))):
        params += list(init_linear(k, fi, fo))
    return tuple(params)


# ---------------------------------------------------------------------------
if __name__ == "__main__":
    batch, input_dim, hidden_dim, output_dim = 8, 16, 32, 8

    key = jax.random.PRNGKey(0)
    kx, kp = jax.random.split(key)
    x = jax.random.normal(kx, (batch, input_dim), jnp.float32)

    raw_params = init_params(kp, input_dim, hidden_dim, output_dim)

    # Pure-JAX reference (same math as the PyTorch module).
    def ref_forward(x, p):
        w1, b1, w2, b2, w3, b3 = p
        h = jnp.maximum(x @ w1 + b1, 0.0)
        h = jnp.maximum(h @ w2 + b2, 0.0)
        return jnp.tanh(h @ w3 + b3)

    ref_mu = ref_forward(x, raw_params)

    # --- f32 packed path (exact) ---
    packed_f32 = pack_params(raw_params, input_dim, hidden_dim, output_dim,
                             dtype=jnp.float32)
    mu_f32 = deterministic_policy_forward(
        x, packed_f32, input_dim=input_dim, hidden_dim=hidden_dim,
        output_dim=output_dim)
    jax.block_until_ready(mu_f32)
    assert mu_f32.shape == (batch, output_dim)
    assert jnp.allclose(mu_f32, ref_mu, atol=1e-5), "f32 mu mismatch"

    # --- bf16 packed path (MXU-native on v6e/v7x; looser tolerance) ---
    packed_bf16 = pack_params(raw_params, input_dim, hidden_dim, output_dim,
                              dtype=jnp.bfloat16)
    mu_bf16 = deterministic_policy_forward(
        x, packed_bf16, input_dim=input_dim, hidden_dim=hidden_dim,
        output_dim=output_dim)
    jax.block_until_ready(mu_bf16)
    assert jnp.allclose(mu_bf16, ref_mu, atol=5e-2), "bf16 mu mismatch"

    print("KERNEL_OK")
</pallas_src>

<mosaic_0001>
module attributes {stable_mosaic.version = 11 : i64} {
  func.func @_policy_kernel(%arg0: i32, %arg1: memref<8x16xf32, #tpu.memory_space<vmem>>, %arg2: memref<104x32xf32, #tpu.memory_space<vmem>>, %arg3: memref<8x8xf32, #tpu.memory_space<vmem>>) attributes {dimension_semantics = [#tpu.dimension_semantics<parallel>], iteration_bounds = array<i64: 1>, scalar_prefetch = 0 : i64, scratch_operands = 0 : i64, tpu.core_type = #tpu.core_type<tc>, window_params = [{transform_indices = @transform_0, window_bounds = array<i64: 8, 16>}, {pipeline_mode = #tpu.pipeline_mode<synchronous>, transform_indices = @transform_1, window_bounds = array<i64: 104, 32>}, {transform_indices = @transform_2, window_bounds = array<i64: 8, 8>}]} {
    %c0 = arith.constant 0 : index
    %c0_0 = arith.constant 0 : index
    %0 = vector.load %arg2[%c0, %c0_0] : memref<104x32xf32, #tpu.memory_space<vmem>>, vector<104x32xf32>
    %1 = vector.extract_strided_slice %0 {offsets = [0, 0], sizes = [16, 32], strides = [1, 1]} : vector<104x32xf32> to vector<16x32xf32>
    %2 = vector.extract_strided_slice %0 {offsets = [16, 0], sizes = [1, 32], strides = [1, 1]} : vector<104x32xf32> to vector<1x32xf32>
    %3 = vector.extract_strided_slice %0 {offsets = [24, 0], sizes = [32, 32], strides = [1, 1]} : vector<104x32xf32> to vector<32x32xf32>
    %4 = vector.extract_strided_slice %0 {offsets = [56, 0], sizes = [1, 32], strides = [1, 1]} : vector<104x32xf32> to vector<1x32xf32>
    %5 = vector.extract_strided_slice %0 {offsets = [64, 0], sizes = [32, 8], strides = [1, 1]} : vector<104x32xf32> to vector<32x8xf32>
    %6 = vector.extract_strided_slice %0 {offsets = [96, 0], sizes = [1, 8], strides = [1, 1]} : vector<104x32xf32> to vector<1x8xf32>
    %c0_1 = arith.constant 0 : index
    %c0_2 = arith.constant 0 : index
    %7 = vector.load %arg1[%c0_1, %c0_2] : memref<8x16xf32, #tpu.memory_space<vmem>>, vector<8x16xf32>
    %cst = arith.constant dense<0.000000e+00> : vector<8x32xf32>
    %8 = tpu.matmul %7, %1, %cst {dimension_numbers = #tpu.dot_dimension_numbers<[1], [0], [0], [1], [0, 0, 1, 1], [], []>} : vector<8x16xf32>, vector<16x32xf32>, vector<8x32xf32> -> vector<8x32xf32>
    %9 = vector.broadcast %2 : vector<1x32xf32> to vector<8x32xf32>
    %10 = arith.addf %8, %9 : vector<8x32xf32>
    %cst_3 = arith.constant 0.000000e+00 : f32
    %11 = vector.broadcast %cst_3 : f32 to vector<8x32xf32>
    %12 = arith.maximumf %10, %11 : vector<8x32xf32>
    %cst_4 = arith.constant dense<0.000000e+00> : vector<8x32xf32>
    %13 = tpu.matmul %12, %3, %cst_4 {dimension_numbers = #tpu.dot_dimension_numbers<[1], [0], [0], [1], [0, 0, 1, 1], [], []>} : vector<8x32xf32>, vector<32x32xf32>, vector<8x32xf32> -> vector<8x32xf32>
    %14 = vector.broadcast %4 : vector<1x32xf32> to vector<8x32xf32>
    %15 = arith.addf %13, %14 : vector<8x32xf32>
    %cst_5 = arith.constant 0.000000e+00 : f32
    %16 = vector.broadcast %cst_5 : f32 to vector<8x32xf32>
    %17 = arith.maximumf %15, %16 : vector<8x32xf32>
    %cst_6 = arith.constant dense<0.000000e+00> : vector<8x8xf32>
    %18 = tpu.matmul %17, %5, %cst_6 {dimension_numbers = #tpu.dot_dimension_numbers<[1], [0], [0], [1], [0, 0, 1, 1], [], []>} : vector<8x32xf32>, vector<32x8xf32>, vector<8x8xf32> -> vector<8x8xf32>
    %19 = vector.broadcast %6 : vector<1x8xf32> to vector<8x8xf32>
    %20 = arith.addf %18, %19 : vector<8x8xf32>
    %21 = math.tanh %20 : vector<8x8xf32>
    %c0_7 = arith.constant 0 : index
    %c0_8 = arith.constant 0 : index
    %22 = vector.load %arg3[%c0_7, %c0_8] : memref<8x8xf32, #tpu.memory_space<vmem>>, vector<8x8xf32>
    tpu.vector_store %arg3[%c0_7, %c0_8], %21 {strides = array<i32>} : memref<8x8xf32, #tpu.memory_space<vmem>>, vector<8x8xf32>,
    return
  }
  func.func @transform_0(%arg0: i32) -> (i32, i32) {
    %c0_i32 = arith.constant 0 : i32
    %c0_i32_0 = arith.constant 0 : i32
    return %arg0, %c0_i32 : i32, i32
  }
  func.func @transform_1(%arg0: i32) -> (i32, i32) {
    %c0_i32 = arith.constant 0 : i32
    %c0_i32_0 = arith.constant 0 : i32
    %c0_i32_1 = arith.constant 0 : i32
    return %c0_i32, %c0_i32_0 : i32, i32
  }
  func.func @transform_2(%arg0: i32) -> (i32, i32) {
    %c0_i32 = arith.constant 0 : i32
    %c0_i32_0 = arith.constant 0 : i32
    return %arg0, %c0_i32 : i32, i32
  }
}

</mosaic_0001>

<bundles_post_ra>
// kernel: deterministic_policy_forward.1
= control target key start
LH: loop header
LB: loop body
LE: loop exit
PB: predicated region body
PF: predicated region fallthrough
CT: control target
= control target key end

     0   :  { %v368_v2 = vmov 0.0|0.0   ;;  %vm369_vm0 = vmmov 0   ;;  %v370_v4 = vmov 0.0   ;;  %s444_s0 = inlined_call_operand.vmem [shape: f32[8,16], index: 0, kind: input, shape index: {}]   ;;  %s445_s1 = inlined_call_operand.vmem [shape: f32[104,32], index: 1, kind: input, shape index: {}]   ;;  %s446_s2 = inlined_call_operand.hbm [shape: f32[8,8], index: 2, kind: output, shape index: {}]  }
   0x1   :  { %v12_v0 = vld [vmem:[%s445_s1] sm:$0xff]  ;;  %v13_v1 = vld [vmem:[%s445_s1 + $0x8] sm:$0xff]  ;;  %323 = vmatprep.subr.bf16.mxu0 %v368_v2  ;;  %298 = vmatprep.mubr.msk.f32.mxu0 %vm369_vm0, %v370_v4  ;;  %v15_v5 = vld [vmem:[%s445_s1 + $0x18] sm:$0xff] }
   0x2   :  { %v324_v3 = vpack.c.bf16 %v13_v1, %v12_v0  ;;  %v16_v6 = vld [vmem:[%s445_s1 + $0x20] sm:$0xff]  ;;  %326 = vmatprep.subr.bf16.mxu1 %v368_v2  ;;  %309 = vmatprep.mubr.msk.f32.mxu1 %vm369_vm0, %v370_v4 }
   0x3   :  { %v327_v7 = vpack.c.bf16 %v16_v6, %v15_v5 }
   0x4   :  { %7 = vsyncpa [#allocation3], 0  ;;  %325 = vmatpush3.bf16.msra.mxu0 %v324_v3  ;;  %v25_v8 = vld [vmem:[%s444_s0] sm:$0xff]  ;;  %vm30_vm1 = vcmask 130048   ;;  %v17_v9 = vld [vmem:[%s445_s1 + $0x28] sm:$0xff]  ;;  %v26_v15 = vlaneseq  ;;  %vm109_vm2 = vcmask 261120  }
   0x5   :  { %328 = vmatpush3.bf16.msra.mxu1 %v327_v7  ;;  %332 = vmatprep.subr.bf16.mxu0 %v368_v2  ;;  %v18_v10 = vld [vmem:[%s445_s1 + $0x30] sm:$0xff]  ;;  %v20_v12 = vld [vmem:[%s445_s1 + $0x40] sm:$0xff]  ;;  %v21_v13 = vld [vmem:[%s445_s1 + $0x48] sm:$0xff]  ;;  %s371_s8 = smov [#allocation2]   ;;  %vm262_vm3 = vcmask 64512  }
   0x6   :  { %329 = vmatprep.subr.bf16.mxu1 %v368_v2  ;;  %v330_v11 = vpack.c.bf16 %v18_v10, %v17_v9  ;;  %v333_v14 = vpack.c.bf16 %v21_v13, %v20_v12  ;;  %v27_v16 = vshrl.u32 %v26_v15, 7  ;;  %v14_v18 = vld [vmem:[%s445_s1 + $0x10] sm:$0xff]  ;;  %v23_v25 = vld [vmem:[%s445_s1 + $0x58] sm:$0xff]  ;;  %v24_v33 = vld [vmem:[%s445_s1 + $0x60] sm:$0xff]  ;;  %s270_s9 = sshll.u32 %s371_s8, 4  ;;  %s271_s9 = int_to_ptr.vmem [resolvable:$true] %s270_s9 }
   0x7   :  { %299 = vmatmul.mubr.msk.f32.vlgmr.msra.gmra.mrb[0].mxu0 %vm30_vm1, %v25_v8  ;;  %v22_v24 = vld [vmem:[%s445_s1 + $0x50] sm:$0xff]  ;;  %v19_v27 = vld [vmem:[%s445_s1 + $0x38] sm:$0xff]  ;;  %s344_s10 = scalar_lea.vmem %s271_s9, 128  ;;  %p349_p1 = scmp.lt.s32.totalorder %s271_s9, %s271_s9 }
   0x8   :  { %320 = vmatprep.mubr.msk.f32.mxu0 %vm369_vm0, %v370_v4  ;;  %334 = vmatpush3.bf16.msra.mxu0 %v333_v14  ;;  %v28_v17 = vsub.s32 0, %v27_v16  ;;  %v336_v26 = vpack.c.bf16 %v23_v25, %v22_v24  ;;  %p345_p0 = scmp.ne.s32.totalorder %s271_s9, %s344_s10  ;;  %p350_p2 = scmp.lt.s32.totalorder %s344_s10, %s344_s10 }
   0x9   :  { %331 = vmatpush3.bf16.msra.mxu1 %v330_v11  ;;  %335 = vmatprep.subr.bf16.mxu0 %v368_v2 }
   0xa   :  { %v29_v19 = vrot.slane %v14_v18, %v28_v17  ;;  %v108_v28 = vrot.slane %v19_v27, %v28_v17  ;;  %v187_v34 = vrot.slane %v24_v33, %v28_v17  ;;  %p351_p3 = por %p350_p2, %p349_p1 }
   0xc   :  { %337 = vmatpush3.bf16.msra.mxu0 %v336_v26  ;;  %p352_p4 = pnand %p351_p3, %p345_p0 }
  0xda   :  { %v100_v20 = vpop.f32.mrb[0].mxu0 }
  0xdb   :  { %v101_v21 = vadd.f32 %v100_v20, %v29_v19  ;;  %v300_v22 = vpop.f32.mrb[1].mxu0 }
  0xdd   :  { %v104_v23 = vmax.f32 %v101_v21, 0.0 }
  0xdf   :  { %310 = vmatmul.mubr.msk.f32.vlgmr.msra.gmra.mrb[0].mxu1 %vm109_vm2, %v104_v23 }
 0x1b2   :  { %v179_v29 = vpop.f32.mrb[0].mxu1 }
 0x1b3   :  { %v180_v30 = vadd.f32 %v179_v29, %v108_v28  ;;  %v311_v31 = vpop.f32.mrb[1].mxu1 }
 0x1b5   :  { %v183_v32 = vmax.f32 %v180_v30, 0.0 }
 0x1b7   :  { %321 = vmatmul.mubr.msk.f32.vlgmr.msra.gmra.mrb[2].mxu0 %vm109_vm2, %v183_v32 }
 0x28a   :  { %v257_v35 = vpop.f32.mrb[2].mxu0 }
 0x28b   :  { %v258_v36 = vadd.f32 %v257_v35, %v187_v34  ;;  %v322_v37 = vpop.f32.mrb[3].mxu0 }
 0x28d   :  { %342 = vtanh.f32 %v258_v36 }
 0x297   :  { %v343_v38 = vpop.eup %342 }
 0x298   :  { %263 = vst.msk [vmem:[#allocation2] sm:$0xff] %vm262_vm3, %v343_v38 }
 0x299   :  { %355 = shalt.err (!%p352_p4)
}
 0x29a   :  { %s356_s12 = scalar_lea.hbm %s446_s2, 128 }
 0x29b   :  { %p357_p5 = scmp.ne.s32.totalorder %s446_s2, %s356_s12  ;;  %p360_p6 = scmp.lt.u32.totalorder %s356_s12, %s446_s2 }
 0x29d   :  { %p362_p7 = pnand %p360_p6, %p357_p5 }
 0x29f   :  { %365 = shalt.err (!%p362_p7)
}
 0x2a0   :  { %273 = dma.vmem_to_hbm [thread:$0]  %s271_s9, 128, %s446_s2, [#allocation3]  }
 0x2a1   :  { %366 = dma.done.wait [#allocation3], 128  }
 0x2a2   :  { %367 = vsyncadd [#allocation3], 4294967168 }
 0x2a3   :  { %277 = vsyncpa [#allocation3], 1 }

</bundles_post_ra>
